<compile_context>
chip_gen: v7x
topology: tpu7x:2x2x1
jax: 0.10.0
libtpu: 0.0.40
codegen_flags: <defaults>
</compile_context>

<pallas_src>
import jax
import jax.numpy as jnp
import numpy as np
from jax.experimental import pallas as pl
from jax.experimental.pallas import tpu as pltpu

NEG_SLOPE = 0.2  # nn.LeakyReLU(0.2)


def _lrelu(v):
    return jnp.where(v >= 0, v, NEG_SLOPE * v)


def _resblock_kernel(x_ref, wsb_ref, w0r_ref, b0_ref, w1r_ref, b1_ref,
                     sup_ref, sdn_ref, out_ref):
    # x: (H, W*cin), everything stays in this lane-dense packed layout.
    x = x_ref[0]
    sup = sup_ref[...]          # (H, H) reflected shift "row above"
    sdn = sdn_ref[...]          # (H, H) reflected shift "row below"

    # learned shortcut: 1x1 conv, no bias (block-diagonal packed weight)
    xs = jnp.dot(x, wsb_ref[...], preferred_element_type=jnp.float32)

    # conv_0: lrelu -> reflect pad -> 3x3 conv (+bias)
    a = _lrelu(x)
    a_up = jnp.dot(sup, a, preferred_element_type=jnp.float32)
    a_dn = jnp.dot(sdn, a, preferred_element_type=jnp.float32)
    h = (jnp.dot(a_up, w0r_ref[0], preferred_element_type=jnp.float32)
         + jnp.dot(a,    w0r_ref[1], preferred_element_type=jnp.float32)
         + jnp.dot(a_dn, w0r_ref[2], preferred_element_type=jnp.float32)
         + b0_ref[...])                                   # (H, W*chid)

    # conv_1: lrelu -> reflect pad -> 3x3 conv (+bias)
    g = _lrelu(h)
    g_up = jnp.dot(sup, g, preferred_element_type=jnp.float32)
    g_dn = jnp.dot(sdn, g, preferred_element_type=jnp.float32)
    d = (jnp.dot(g_up, w1r_ref[0], preferred_element_type=jnp.float32)
         + jnp.dot(g,    w1r_ref[1], preferred_element_type=jnp.float32)
         + jnp.dot(g_dn, w1r_ref[2], preferred_element_type=jnp.float32)
         + b1_ref[...])                                   # (H, W*cout)

    out_ref[0] = (xs + d).astype(out_ref.dtype)


def _build_row_tap_map(W):
    """M[dw, wi, wo] = 1 if reflect(wo + dw - 1) == wi  (ReflectionPad2d(1) in W)."""
    M = np.zeros((3, W, W), np.float32)
    for dw in range(3):
        for wo in range(W):
            wi = wo + dw - 1
            if wi < 0:
                wi = -wi
            elif wi >= W:
                wi = 2 * W - 2 - wi
            M[dw, wi, wo] += 1.0
    return M


def _build_h_shift(H):
    """Reflected row-shift matrices: (S_up @ A)[h] = A[reflect(h-1)], (S_dn @ A)[h] = A[reflect(h+1)]."""
    sup = np.zeros((H, H), np.float32)
    sup[np.arange(1, H), np.arange(0, H - 1)] = 1.0
    sup[0, 1] = 1.0
    sdn = np.zeros((H, H), np.float32)
    sdn[np.arange(0, H - 1), np.arange(1, H)] = 1.0
    sdn[H - 1, H - 2] = 1.0
    return sup, sdn


def act_first_res_block(x_nchw, params):
    """x_nchw: (N, Cin, H, W) like PyTorch. Returns (N, Cout, H, W)."""
    w0, b0, w1, b1, ws = params            # HWIO conv weights, 1-D biases, (cin,cout) shortcut
    N, cin, H, W = x_nchw.shape
    chid = w0.shape[-1]
    cout = w1.shape[-1]

    # Lane-dense packed activations: (N, H, W*Cin)  (W*cin = 64 lanes)
    x = jnp.transpose(x_nchw, (0, 2, 3, 1)).reshape(N, H, W * cin)

    # Fold the 3 W-taps + W-reflection into per-dh banded weights (W*cin, W*cout_layer).
    Mj = jnp.asarray(_build_row_tap_map(W))
    w0r = jnp.einsum('aio,kacd->kicod', Mj, w0).reshape(3, W * cin, W * chid)
    w1r = jnp.einsum('aio,kacd->kicod', Mj, w1).reshape(3, W * chid, W * cout)
    # Block-diagonal packed 1x1 shortcut weight.
    wsb = jnp.einsum('io,cd->icod', jnp.eye(W, dtype=x.dtype), ws).reshape(W * cin, W * cout)
    # Pre-tiled bias rows (one broadcast add per conv).
    b0r = jnp.tile(jnp.reshape(b0, (-1,)), W).reshape(1, W * chid)
    b1r = jnp.tile(jnp.reshape(b1, (-1,)), W).reshape(1, W * cout)
    # Reflected H-shift matrices.
    sup_np, sdn_np = _build_h_shift(H)
    sup = jnp.asarray(sup_np)
    sdn = jnp.asarray(sdn_np)

    out = pl.pallas_call(
        _resblock_kernel,
        out_shape=jax.ShapeDtypeStruct((N, H, W * cout), x.dtype),
        grid_spec=pltpu.PrefetchScalarGridSpec(
            num_scalar_prefetch=0,
            grid=(N,),   # one image per step; shards across the 2 v7x TCs
            in_specs=[
                pl.BlockSpec((1, H, W * cin), lambda n: (n, 0, 0)),
                pl.BlockSpec((W * cin, W * cout), lambda n: (0, 0)),
                pl.BlockSpec((3, W * cin, W * chid), lambda n: (0, 0, 0)),
                pl.BlockSpec((1, W * chid), lambda n: (0, 0)),
                pl.BlockSpec((3, W * chid, W * cout), lambda n: (0, 0, 0)),
                pl.BlockSpec((1, W * cout), lambda n: (0, 0)),
                pl.BlockSpec((H, H), lambda n: (0, 0)),
                pl.BlockSpec((H, H), lambda n: (0, 0)),
            ],
            out_specs=pl.BlockSpec((1, H, W * cout), lambda n: (n, 0, 0)),
        ),
        compiler_params=pltpu.CompilerParams(
            dimension_semantics=("parallel",)),
    )(x, wsb, w0r, b0r, w1r, b1r, sup, sdn)

    # Unpack lane-dense output back to NCHW (layout plumbing outside the kernel).
    out = out.reshape(N, H, W, cout)
    return jnp.transpose(out, (0, 3, 1, 2))


def _ref_forward(x_nchw, params):
    """Pure-JAX reference (same math, lax.conv + reflect pad), NCHW in/out."""
    w0, b0, w1, b1, ws = params
    x = jnp.transpose(x_nchw, (0, 2, 3, 1))

    def conv3x3(a, w, b):
        ap = jnp.pad(a, ((0, 0), (1, 1), (1, 1), (0, 0)), mode="reflect")
        y = jax.lax.conv_general_dilated(
            ap, w, window_strides=(1, 1), padding="VALID",
            dimension_numbers=("NHWC", "HWIO", "NHWC"))
        return y + b.reshape(1, 1, 1, -1)

    xs = jnp.einsum("nhwc,cd->nhwd", x, ws)
    h = conv3x3(_lrelu(x), w0, b0)
    d = conv3x3(_lrelu(h), w1, b1)
    return jnp.transpose(xs + d, (0, 3, 1, 2))


if __name__ == "__main__":
    fin, fout = 4, 8
    fhid = max(fin, fout)          # ActFirstResBlock default: fhid = max(fin, fout)
    N, H, W = 2, 16, 16

    key = jax.random.PRNGKey(0)
    ks = jax.random.split(key, 6)
    x = jax.random.normal(ks[0], (N, fin, H, W), jnp.float32)
    w0 = jax.random.normal(ks[1], (3, 3, fin, fhid), jnp.float32) * 0.1
    b0 = jax.random.normal(ks[2], (fhid,), jnp.float32) * 0.1
    w1 = jax.random.normal(ks[3], (3, 3, fhid, fout), jnp.float32) * 0.1
    b1 = jax.random.normal(ks[4], (fout,), jnp.float32) * 0.1
    ws = jax.random.normal(ks[5], (fin, fout), jnp.float32) * 0.1
    params = (w0, b0, w1, b1, ws)

    fwd = jax.jit(act_first_res_block)
    out = jax.block_until_ready(fwd(x, params))
    ref = jax.block_until_ready(_ref_forward(x, params))

    assert out.shape == (N, fout, H, W), out.shape
    np.testing.assert_allclose(np.asarray(out), np.asarray(ref),
                               rtol=1e-4, atol=1e-4)
    print("KERNEL_OK")
</pallas_src>

<mosaic_0001>
module attributes {stable_mosaic.version = 11 : i64} {
  func.func @_resblock_kernel(%arg0: i32, %arg1: memref<1x16x64xf32, #tpu.memory_space<vmem>>, %arg2: memref<64x128xf32, #tpu.memory_space<vmem>>, %arg3: memref<3x64x128xf32, #tpu.memory_space<vmem>>, %arg4: memref<1x128xf32, #tpu.memory_space<vmem>>, %arg5: memref<3x128x128xf32, #tpu.memory_space<vmem>>, %arg6: memref<1x128xf32, #tpu.memory_space<vmem>>, %arg7: memref<16x16xf32, #tpu.memory_space<vmem>>, %arg8: memref<16x16xf32, #tpu.memory_space<vmem>>, %arg9: memref<1x16x128xf32, #tpu.memory_space<vmem>>) attributes {dimension_semantics = [#tpu.dimension_semantics<parallel>], iteration_bounds = array<i64: 2>, scalar_prefetch = 0 : i64, scratch_operands = 0 : i64, tpu.core_type = #tpu.core_type<tc>, window_params = [{transform_indices = @transform_0, window_bounds = array<i64: 1, 16, 64>}, {pipeline_mode = #tpu.pipeline_mode<synchronous>, transform_indices = @transform_1, window_bounds = array<i64: 64, 128>}, {pipeline_mode = #tpu.pipeline_mode<synchronous>, transform_indices = @transform_2, window_bounds = array<i64: 3, 64, 128>}, {pipeline_mode = #tpu.pipeline_mode<synchronous>, transform_indices = @transform_3, window_bounds = array<i64: 1, 128>}, {pipeline_mode = #tpu.pipeline_mode<synchronous>, transform_indices = @transform_4, window_bounds = array<i64: 3, 128, 128>}, {pipeline_mode = #tpu.pipeline_mode<synchronous>, transform_indices = @transform_5, window_bounds = array<i64: 1, 128>}, {pipeline_mode = #tpu.pipeline_mode<synchronous>, transform_indices = @transform_6, window_bounds = array<i64: 16, 16>}, {pipeline_mode = #tpu.pipeline_mode<synchronous>, transform_indices = @transform_7, window_bounds = array<i64: 16, 16>}, {transform_indices = @transform_8, window_bounds = array<i64: 1, 16, 128>}]} {
    %c0 = arith.constant 0 : index
    %c0_0 = arith.constant 0 : index
    %c0_1 = arith.constant 0 : index
    %0 = vector.load %arg1[%c0, %c0_0, %c0_1] : memref<1x16x64xf32, #tpu.memory_space<vmem>>, vector<1x16x64xf32>
    %1 = vector.shape_cast %0 : vector<1x16x64xf32> to vector<16x64xf32>
    %c0_2 = arith.constant 0 : index
    %c0_3 = arith.constant 0 : index
    %2 = vector.load %arg7[%c0_2, %c0_3] : memref<16x16xf32, #tpu.memory_space<vmem>>, vector<16x16xf32>
    %c0_4 = arith.constant 0 : index
    %c0_5 = arith.constant 0 : index
    %3 = vector.load %arg8[%c0_4, %c0_5] : memref<16x16xf32, #tpu.memory_space<vmem>>, vector<16x16xf32>
    %c0_6 = arith.constant 0 : index
    %c0_7 = arith.constant 0 : index
    %4 = vector.load %arg2[%c0_6, %c0_7] : memref<64x128xf32, #tpu.memory_space<vmem>>, vector<64x128xf32>
    %cst = arith.constant dense<0.000000e+00> : vector<16x128xf32>
    %5 = tpu.matmul %1, %4, %cst {dimension_numbers = #tpu.dot_dimension_numbers<[1], [0], [0], [1], [0, 0, 1, 1], [], []>} : vector<16x64xf32>, vector<64x128xf32>, vector<16x128xf32> -> vector<16x128xf32>
    %cst_8 = arith.constant 0.000000e+00 : f32
    %6 = vector.broadcast %cst_8 : f32 to vector<16x64xf32>
    %7 = arith.cmpf oge, %1, %6 : vector<16x64xf32>
    %cst_9 = arith.constant 2.000000e-01 : f32
    %8 = vector.broadcast %cst_9 : f32 to vector<16x64xf32>
    %9 = arith.mulf %8, %1 : vector<16x64xf32>
    %10 = arith.select %7, %1, %9 : vector<16x64xi1>, vector<16x64xf32>
    %cst_10 = arith.constant dense<0.000000e+00> : vector<16x64xf32>
    %11 = tpu.matmul %2, %10, %cst_10 {dimension_numbers = #tpu.dot_dimension_numbers<[1], [0], [0], [1], [0, 0, 1, 1], [], []>} : vector<16x16xf32>, vector<16x64xf32>, vector<16x64xf32> -> vector<16x64xf32>
    %cst_11 = arith.constant dense<0.000000e+00> : vector<16x64xf32>
    %12 = tpu.matmul %3, %10, %cst_11 {dimension_numbers = #tpu.dot_dimension_numbers<[1], [0], [0], [1], [0, 0, 1, 1], [], []>} : vector<16x16xf32>, vector<16x64xf32>, vector<16x64xf32> -> vector<16x64xf32>
    %c0_12 = arith.constant 0 : index
    %c0_13 = arith.constant 0 : index
    %c0_14 = arith.constant 0 : index
    %13 = vector.load %arg3[%c0_12, %c0_13, %c0_14] : memref<3x64x128xf32, #tpu.memory_space<vmem>>, vector<1x64x128xf32>
    %14 = vector.shape_cast %13 : vector<1x64x128xf32> to vector<64x128xf32>
    %cst_15 = arith.constant dense<0.000000e+00> : vector<16x128xf32>
    %15 = tpu.matmul %11, %14, %cst_15 {dimension_numbers = #tpu.dot_dimension_numbers<[1], [0], [0], [1], [0, 0, 1, 1], [], []>} : vector<16x64xf32>, vector<64x128xf32>, vector<16x128xf32> -> vector<16x128xf32>
    %c1 = arith.constant 1 : index
    %c0_16 = arith.constant 0 : index
    %c0_17 = arith.constant 0 : index
    %16 = vector.load %arg3[%c1, %c0_16, %c0_17] : memref<3x64x128xf32, #tpu.memory_space<vmem>>, vector<1x64x128xf32>
    %17 = vector.shape_cast %16 : vector<1x64x128xf32> to vector<64x128xf32>
    %cst_18 = arith.constant dense<0.000000e+00> : vector<16x128xf32>
    %18 = tpu.matmul %10, %17, %cst_18 {dimension_numbers = #tpu.dot_dimension_numbers<[1], [0], [0], [1], [0, 0, 1, 1], [], []>} : vector<16x64xf32>, vector<64x128xf32>, vector<16x128xf32> -> vector<16x128xf32>
    %19 = arith.addf %15, %18 : vector<16x128xf32>
    %c2 = arith.constant 2 : index
    %c0_19 = arith.constant 0 : index
    %c0_20 = arith.constant 0 : index
    %20 = vector.load %arg3[%c2, %c0_19, %c0_20] : memref<3x64x128xf32, #tpu.memory_space<vmem>>, vector<1x64x128xf32>
    %21 = vector.shape_cast %20 : vector<1x64x128xf32> to vector<64x128xf32>
    %cst_21 = arith.constant dense<0.000000e+00> : vector<16x128xf32>
    %22 = tpu.matmul %12, %21, %cst_21 {dimension_numbers = #tpu.dot_dimension_numbers<[1], [0], [0], [1], [0, 0, 1, 1], [], []>} : vector<16x64xf32>, vector<64x128xf32>, vector<16x128xf32> -> vector<16x128xf32>
    %23 = arith.addf %19, %22 : vector<16x128xf32>
    %c0_22 = arith.constant 0 : index
    %c0_23 = arith.constant 0 : index
    %24 = vector.load %arg4[%c0_22, %c0_23] : memref<1x128xf32, #tpu.memory_space<vmem>>, vector<1x128xf32>
    %25 = vector.broadcast %24 : vector<1x128xf32> to vector<16x128xf32>
    %26 = arith.addf %23, %25 : vector<16x128xf32>
    %cst_24 = arith.constant 0.000000e+00 : f32
    %27 = vector.broadcast %cst_24 : f32 to vector<16x128xf32>
    %28 = arith.cmpf oge, %26, %27 : vector<16x128xf32>
    %cst_25 = arith.constant 2.000000e-01 : f32
    %29 = vector.broadcast %cst_25 : f32 to vector<16x128xf32>
    %30 = arith.mulf %29, %26 : vector<16x128xf32>
    %31 = arith.select %28, %26, %30 : vector<16x128xi1>, vector<16x128xf32>
    %cst_26 = arith.constant dense<0.000000e+00> : vector<16x128xf32>
    %32 = tpu.matmul %2, %31, %cst_26 {dimension_numbers = #tpu.dot_dimension_numbers<[1], [0], [0], [1], [0, 0, 1, 1], [], []>} : vector<16x16xf32>, vector<16x128xf32>, vector<16x128xf32> -> vector<16x128xf32>
    %cst_27 = arith.constant dense<0.000000e+00> : vector<16x128xf32>
    %33 = tpu.matmul %3, %31, %cst_27 {dimension_numbers = #tpu.dot_dimension_numbers<[1], [0], [0], [1], [0, 0, 1, 1], [], []>} : vector<16x16xf32>, vector<16x128xf32>, vector<16x128xf32> -> vector<16x128xf32>
    %c0_28 = arith.constant 0 : index
    %c0_29 = arith.constant 0 : index
    %c0_30 = arith.constant 0 : index
    %34 = vector.load %arg5[%c0_28, %c0_29, %c0_30] : memref<3x128x128xf32, #tpu.memory_space<vmem>>, vector<1x128x128xf32>
    %35 = vector.shape_cast %34 : vector<1x128x128xf32> to vector<128x128xf32>
    %cst_31 = arith.constant dense<0.000000e+00> : vector<16x128xf32>
    %36 = tpu.matmul %32, %35, %cst_31 {dimension_numbers = #tpu.dot_dimension_numbers<[1], [0], [0], [1], [0, 0, 1, 1], [], []>} : vector<16x128xf32>, vector<128x128xf32>, vector<16x128xf32> -> vector<16x128xf32>
    %c1_32 = arith.constant 1 : index
    %c0_33 = arith.constant 0 : index
    %c0_34 = arith.constant 0 : index
    %37 = vector.load %arg5[%c1_32, %c0_33, %c0_34] : memref<3x128x128xf32, #tpu.memory_space<vmem>>, vector<1x128x128xf32>
    %38 = vector.shape_cast %37 : vector<1x128x128xf32> to vector<128x128xf32>
    %cst_35 = arith.constant dense<0.000000e+00> : vector<16x128xf32>
    %39 = tpu.matmul %31, %38, %cst_35 {dimension_numbers = #tpu.dot_dimension_numbers<[1], [0], [0], [1], [0, 0, 1, 1], [], []>} : vector<16x128xf32>, vector<128x128xf32>, vector<16x128xf32> -> vector<16x128xf32>
    %40 = arith.addf %36, %39 : vector<16x128xf32>
    %c2_36 = arith.constant 2 : index
    %c0_37 = arith.constant 0 : index
    %c0_38 = arith.constant 0 : index
    %41 = vector.load %arg5[%c2_36, %c0_37, %c0_38] : memref<3x128x128xf32, #tpu.memory_space<vmem>>, vector<1x128x128xf32>
    %42 = vector.shape_cast %41 : vector<1x128x128xf32> to vector<128x128xf32>
    %cst_39 = arith.constant dense<0.000000e+00> : vector<16x128xf32>
    %43 = tpu.matmul %33, %42, %cst_39 {dimension_numbers = #tpu.dot_dimension_numbers<[1], [0], [0], [1], [0, 0, 1, 1], [], []>} : vector<16x128xf32>, vector<128x128xf32>, vector<16x128xf32> -> vector<16x128xf32>
    %44 = arith.addf %40, %43 : vector<16x128xf32>
    %c0_40 = arith.constant 0 : index
    %c0_41 = arith.constant 0 : index
    %45 = vector.load %arg6[%c0_40, %c0_41] : memref<1x128xf32, #tpu.memory_space<vmem>>, vector<1x128xf32>
    %46 = vector.broadcast %45 : vector<1x128xf32> to vector<16x128xf32>
    %47 = arith.addf %44, %46 : vector<16x128xf32>
    %48 = arith.addf %5, %47 : vector<16x128xf32>
    %c0_42 = arith.constant 0 : index
    %c0_43 = arith.constant 0 : index
    %c0_44 = arith.constant 0 : index
    %49 = vector.load %arg9[%c0_42, %c0_43, %c0_44] : memref<1x16x128xf32, #tpu.memory_space<vmem>>, vector<1x16x128xf32>
    %50 = vector.shape_cast %49 : vector<1x16x128xf32> to vector<16x128xf32>
    %51 = vector.shape_cast %48 : vector<16x128xf32> to vector<1x16x128xf32>
    tpu.vector_store %arg9[%c0_42, %c0_43, %c0_44], %51 {strides = array<i32>} : memref<1x16x128xf32, #tpu.memory_space<vmem>>, vector<1x16x128xf32>,
    return
  }
  func.func @transform_0(%arg0: i32) -> (i32, i32, i32) {
    %c0_i32 = arith.constant 0 : i32
    %c0_i32_0 = arith.constant 0 : i32
    %c0_i32_1 = arith.constant 0 : i32
    return %arg0, %c0_i32, %c0_i32_0 : i32, i32, i32
  }
  func.func @transform_1(%arg0: i32) -> (i32, i32) {
    %c0_i32 = arith.constant 0 : i32
    %c0_i32_0 = arith.constant 0 : i32
    %c0_i32_1 = arith.constant 0 : i32
    return %c0_i32, %c0_i32_0 : i32, i32
  }
  func.func @transform_2(%arg0: i32) -> (i32, i32, i32) {
    %c0_i32 = arith.constant 0 : i32
    %c0_i32_0 = arith.constant 0 : i32
    %c0_i32_1 = arith.constant 0 : i32
    %c0_i32_2 = arith.constant 0 : i32
    return %c0_i32, %c0_i32_0, %c0_i32_1 : i32, i32, i32
  }
  func.func @transform_3(%arg0: i32) -> (i32, i32) {
    %c0_i32 = arith.constant 0 : i32
    %c0_i32_0 = arith.constant 0 : i32
    %c0_i32_1 = arith.constant 0 : i32
    return %c0_i32, %c0_i32_0 : i32, i32
  }
  func.func @transform_4(%arg0: i32) -> (i32, i32, i32) {
    %c0_i32 = arith.constant 0 : i32
    %c0_i32_0 = arith.constant 0 : i32
    %c0_i32_1 = arith.constant 0 : i32
    %c0_i32_2 = arith.constant 0 : i32
    return %c0_i32, %c0_i32_0, %c0_i32_1 : i32, i32, i32
  }
  func.func @transform_5(%arg0: i32) -> (i32, i32) {
    %c0_i32 = arith.constant 0 : i32
    %c0_i32_0 = arith.constant 0 : i32
    %c0_i32_1 = arith.constant 0 : i32
    return %c0_i32, %c0_i32_0 : i32, i32
  }
  func.func @transform_6(%arg0: i32) -> (i32, i32) {
    %c0_i32 = arith.constant 0 : i32
    %c0_i32_0 = arith.constant 0 : i32
    %c0_i32_1 = arith.constant 0 : i32
    return %c0_i32, %c0_i32_0 : i32, i32
  }
  func.func @transform_7(%arg0: i32) -> (i32, i32) {
    %c0_i32 = arith.constant 0 : i32
    %c0_i32_0 = arith.constant 0 : i32
    %c0_i32_1 = arith.constant 0 : i32
    return %c0_i32, %c0_i32_0 : i32, i32
  }
  func.func @transform_8(%arg0: i32) -> (i32, i32, i32) {
    %c0_i32 = arith.constant 0 : i32
    %c0_i32_0 = arith.constant 0 : i32
    %c0_i32_1 = arith.constant 0 : i32
    return %arg0, %c0_i32, %c0_i32_0 : i32, i32, i32
  }
}

</mosaic_0001>

<bundles_post_ra>
// kernel: tile.13
= control target key start
LH: loop header
LB: loop body
LE: loop exit
PB: predicated region body
PF: predicated region fallthrough
CT: control target
= control target key end

     0   :  { %s28_s0 = inlined_call_operand.vmem [shape: f32[8], index: 0, kind: input, shape index: {}]   ;;  %s29_s1 = inlined_call_operand.vmem [shape: f32[16,8], index: 1, kind: output, shape index: {}]  }
   0x1   :  { %v4_v0 = vld [vmem:[%s28_s0] ss:$0 sm:$0xff] }
   0x2   :  { %5 = vst [vmem:[%s29_s1] sm:$0xff] %v4_v0  ;;  %8 = vst [vmem:[%s29_s1 + $0x8] sm:$0xff] %v4_v0 }

// kernel: tile.14
= control target key start
LH: loop header
LB: loop body
LE: loop exit
PB: predicated region body
PF: predicated region fallthrough
CT: control target
= control target key end

     0   :  { %s131_s10 = smov 120   ;;  %s132_s11 = smov 104   ;;  %vm3_vm0 = vcmask 64512   ;;  %vm9_vm1 = vcmask 1048512   ;;  %vm15_vm2 = vcmask 982912   ;;  %vm21_vm3 = vcmask 917312   ;;  %s207_s0 = inlined_call_operand.vmem [shape: f32[16,8], index: 0, kind: input, shape index: {}]   ;;  %s208_s1 = inlined_call_operand.vmem [shape: f32[1,128], index: 1, kind: output, shape index: {}]  }
   0x1   :  { %v101_v0 = vld [vmem:[%s207_s0 + $0xf] sm:$0x1]   ;;  %v103_v1 = vld [vmem:[%s207_s0 + $0xd] sm:$0x1]   ;;  %v102_v2 = vld [vmem:[%s207_s0 + $0xe] sm:$0x1]  }
   0x2   :  { %7 = vrot.lane.b32.xlu0 %v101_v0, %s131_s10  ;;  %19 = vrot.lane.b32.xlu1 %v103_v1, %s132_s11  ;;  %v104_v3 = vld [vmem:[%s207_s0 + $0xc] sm:$0x1]   ;;  %s133_s16 = smov 112   ;;  %s134_s17 = smov 96   ;;  %v105_v4 = vld [vmem:[%s207_s0 + $0xb] sm:$0x1]  }
   0x3   :  { %v106_v5 = vld [vmem:[%s207_s0 + $0xa] sm:$0x1]   ;;  %v2_v6 = vld [vmem:[%s207_s0] sm:$0x1]   ;;  %s135_s24 = smov 88   ;;  %s136_s25 = smov 80  }
   0x4   :  { %4 = vst.msk [vmem:[#allocation0] sm:$0x1] %vm3_vm0, %v2_v6   ;;  %v107_v7 = vld [vmem:[%s207_s0 + $0x9] sm:$0x1]   ;;  %v108_v8 = vld [vmem:[%s207_s0 + $0x8] sm:$0x1]  }
   0x5   :  { %s137_s30 = smov 72   ;;  %s138_s2 = smov 64   ;;  %v109_v9 = vld [vmem:[%s207_s0 + $0x7] sm:$0x1]   ;;  %v110_v10 = vld [vmem:[%s207_s0 + $0x6] sm:$0x1]  }
   0x6   :  { %13 = vrot.lane.b32.xlu0 %v102_v2, %s133_s16  ;;  %25 = vrot.lane.b32.xlu1 %v104_v3, %s134_s17  ;;  %s139_s7 = smov 56   ;;  %s140_s8 = smov 48   ;;  %v111_v11 = vld [vmem:[%s207_s0 + $0x5] sm:$0x1]   ;;  %v112_v12 = vld [vmem:[%s207_s0 + $0x4] sm:$0x1]  }
   0x7   :  { %s141_s13 = smov 40   ;;  %s142_s14 = smov 32   ;;  %v113_v13 = vld [vmem:[%s207_s0 + $0x3] sm:$0x1]   ;;  %v114_v14 = vld [vmem:[%s207_s0 + $0x2] sm:$0x1]  }
   0x8   :  { %s143_s19 = smov 24   ;;  %s144_s20 = smov 16   ;;  %v115_v15 = vld [vmem:[%s207_s0 + $0x1] sm:$0x1]   ;;  %vm27_vm4 = vcmask 851712   ;;  %vm33_vm5 = vcmask 786112  }
   0x9   :  { %s145_s0 = smov 8   ;;  %vm39_vm6 = vcmask 720512   ;;  %vm45_vm7 = vcmask 654912   ;;  %vm51_vm8 = vcmask 589312   ;;  %vm57_vm9 = vcmask 523712  }
   0xa   :  { %31 = vrot.lane.b32.xlu0 %v105_v4, %s135_s24  ;;  %37 = vrot.lane.b32.xlu1 %v106_v5, %s136_s25  ;;  %vm63_vm10 = vcmask 458112   ;;  %vm69_vm11 = vcmask 392512   ;;  %vm75_vm12 = vcmask 326912   ;;  %vm81_vm13 = vcmask 261312  }
   0xb   :  { %vm87_vm14 = vcmask 195712   ;;  %vm93_vm15 = vcmask 130112  }
   0xe   :  { %43 = vrot.lane.b32.xlu0 %v107_v7, %s137_s30  ;;  %49 = vrot.lane.b32.xlu1 %v108_v8, %s138_s2 }
  0x12   :  { %55 = vrot.lane.b32.xlu0 %v109_v9, %s139_s7  ;;  %61 = vrot.lane.b32.xlu1 %v110_v10, %s140_s8 }
  0x16   :  { %67 = vrot.lane.b32.xlu0 %v111_v11, %s141_s13  ;;  %73 = vrot.lane.b32.xlu1 %v112_v12, %s142_s14 }
  0x1a   :  { %79 = vrot.lane.b32.xlu0 %v113_v13, %s143_s19  ;;  %85 = vrot.lane.b32.xlu1 %v114_v14, %s144_s20 }
  0x1e   :  { %91 = vrot.lane.b32.xlu0 %v115_v15, %s145_s0 }
  0x74   :  { %v8_v16 = vpop.permute.xlu0 %7   ;;  %v20_v17 = vpop.permute.xlu1 %19  }
  0x75   :  { %10 = vst.msk [vmem:[#allocation0] sm:$0x1] %vm9_vm1, %v8_v16  }
  0x78   :  { %v14_v18 = vpop.permute.xlu0 %13   ;;  %v26_v19 = vpop.permute.xlu1 %25  }
  0x79   :  { %16 = vst.msk [vmem:[#allocation0] sm:$0x1] %vm15_vm2, %v14_v18  }
  0x7a   :  { %22 = vst.msk [vmem:[#allocation0] sm:$0x1] %vm21_vm3, %v20_v17  }
  0x7b   :  { %28 = vst.msk [vmem:[#allocation0] sm:$0x1] %vm27_vm4, %v26_v19  }
  0x7c   :  { %v32_v20 = vpop.permute.xlu0 %31   ;;  %v38_v21 = vpop.permute.xlu1 %37  }
  0x7d   :  { %34 = vst.msk [vmem:[#allocation0] sm:$0x1] %vm33_vm5, %v32_v20  }
  0x7e   :  { %40 = vst.msk [vmem:[#allocation0] sm:$0x1] %vm39_vm6, %v38_v21  }
  0x80   :  { %v44_v22 = vpop.permute.xlu0 %43   ;;  %v50_v23 = vpop.permute.xlu1 %49  }
  0x81   :  { %46 = vst.msk [vmem:[#allocation0] sm:$0x1] %vm45_vm7, %v44_v22  }
  0x82   :  { %52 = vst.msk [vmem:[#allocation0] sm:$0x1] %vm51_vm8, %v50_v23  }
  0x84   :  { %v56_v24 = vpop.permute.xlu0 %55   ;;  %v62_v25 = vpop.permute.xlu1 %61  }
  0x85   :  { %58 = vst.msk [vmem:[#allocation0] sm:$0x1] %vm57_vm9, %v56_v24  }
  0x86   :  { %64 = vst.msk [vmem:[#allocation0] sm:$0x1] %vm63_vm10, %v62_v25  }
  0x88   :  { %v68_v26 = vpop.permute.xlu0 %67   ;;  %v74_v27 = vpop.permute.xlu1 %73  }
  0x89   :  { %70 = vst.msk [vmem:[#allocation0] sm:$0x1] %vm69_vm11, %v68_v26  }
  0x8a   :  { %76 = vst.msk [vmem:[#allocation0] sm:$0x1] %vm75_vm12, %v74_v27  }
  0x8c   :  { %v80_v28 = vpop.permute.xlu0 %79   ;;  %v86_v29 = vpop.permute.xlu1 %85  }
  0x8d   :  { %82 = vst.msk [vmem:[#allocation0] sm:$0x1] %vm81_vm13, %v80_v28  }
  0x8e   :  { %88 = vst.msk [vmem:[#allocation0] sm:$0x1] %vm87_vm14, %v86_v29  }
  0x90   :  { %v92_v30 = vpop.permute.xlu0 %91  }
  0x91   :  { %94 = vst.msk [vmem:[#allocation0] sm:$0x1] %vm93_vm15, %v92_v30  }
  0x98   :  { %v98_v31 = vld [vmem:[#allocation0] sm:$0x1] }
  0x99   :  { %100 = vst [vmem:[%s208_s1] sm:$0x1] %v98_v31 }

// kernel: act_first_res_block.1
= control target key start
LH: loop header
LB: loop body
LE: loop exit
PB: predicated region body
PF: predicated region fallthrough
CT: control target
= control target key end

     0   :  { %s1997_s27 = smov 0   ;;  %s2325_s0 = inlined_call_operand.vmem [shape: f32[2,16,64], index: 0, kind: input, shape index: {}]   ;;  %s2326_s1 = inlined_call_operand.vmem [shape: f32[64,128], index: 1, kind: input, shape index: {}]   ;;  %s2327_s2 = inlined_call_operand.vmem [shape: f32[3,64,128], index: 2, kind: input, shape index: {}]   ;;  %s2328_s3 = inlined_call_operand.vmem [shape: f32[1,128], index: 3, kind: input, shape index: {}]   ;;  %s2329_s4 = inlined_call_operand.vmem [shape: f32[3,128,128], index: 4, kind: input, shape index: {}]   ;;  %s2330_s5 = inlined_call_operand.vmem [shape: f32[1,128], index: 5, kind: input, shape index: {}]   ;;  %s2331_s6 = inlined_call_operand.vmem [shape: f32[16,16], index: 6, kind: input, shape index: {}]   ;;  %s2332_s7 = inlined_call_operand.vmem [shape: f32[16,16], index: 7, kind: input, shape index: {}]   ;;  %s2333_s8 = inlined_call_operand.vmem [shape: f32[2,16,128], index: 8, kind: output, shape index: {}]  }
   0x1 LB: > { %s1350_s28 = sadd.s32 4294967295, %s1950_s27   ;;  %p1354_p0 = scmp.ge.s32.totalorder %s1950_s27, 1  ;;  %s1950_s27 = sphi %s1997_s27, %s18_s27  }
   0x2   : > { %p262_p1 = scmp.lt.s32.totalorder %s1950_s27, 3 }
   0x4   : > { %p263_p2 = pnand %p1354_p0, %p262_p1 }
   0x5   : > { %p296_p3 = scmp.lt.s32.totalorder (!%p263_p2), %s1350_s28, 1  ;;  %v308_v0 = vld [vmem:[%s2331_s6] sm:$0xff] (!%p263_p2)  ;;  %vm326_vm0 = vcmask (!%p263_p2), 130048   ;;  %v1364_v9 = vld [vmem:[%s2327_s2 + $0x48] sm:$0xff] (!%p263_p2)  ;;  %v1365_v13 = vld [vmem:[%s2327_s2 + $0x50] sm:$0xff] (!%p263_p2)  ;;  %vm506_vm3 = vcmask (!%p263_p2), 523264  }
   0x6   : > { %266 = sbr.rel (%p263_p2) target bundleno = 958 (0x3be), region = 52  ;;  %1543 = vmatprep.mubr.msk.f32.mxu0 (!%p263_p2), %vm326_vm0, %v308_v0  ;;  %1614 = vmatprep.mubr.msk.f32.mxu1 (!%p263_p2), %vm326_vm0, %v308_v0  ;;  %v1363_v8 = vld [vmem:[%s2327_s2 + $0x40] sm:$0xff] (!%p263_p2)  ;;  %v2037_v10 = vld [vmem:[%s2331_s6 + $0x8] sm:$0xff] (!%p263_p2)  ;;  %v1366_v14 = vld [vmem:[%s2327_s2 + $0x58] sm:$0xff] (!%p263_p2) }
   0x7   : > { %v2042_v11 = vld [vmem:[%s2332_s7] sm:$0xff] (!%p263_p2)  ;;  %v1756_v12 = vpack.c.bf16 (!%p263_p2), %v1364_v9, %v1363_v8  ;;  %v2057_v15 = vld [vmem:[%s2332_s7 + $0x8] sm:$0xff] (!%p263_p2)  ;;  %v1760_v16 = vpack.c.bf16 (!%p263_p2), %v1366_v14, %v1365_v13  ;;  %v1369_v20 = vld [vmem:[%s2327_s2 + $0x70] sm:$0xff] (!%p263_p2) }
   0x8   : > { %v1367_v17 = vld [vmem:[%s2327_s2 + $0x60] sm:$0xff] (!%p263_p2)  ;;  %v1368_v18 = vld [vmem:[%s2327_s2 + $0x68] sm:$0xff] (!%p263_p2)  ;;  %v1370_v21 = vld [vmem:[%s2327_s2 + $0x78] sm:$0xff] (!%p263_p2) }
   0x9   : > { %v1764_v19 = vpack.c.bf16 (!%p263_p2), %v1368_v18, %v1367_v17  ;;  %v1768_v22 = vpack.c.bf16 (!%p263_p2), %v1370_v21, %v1369_v20  ;;  %v489_v23 = vld [vmem:[%s2327_s2] sm:$0xff] (!%p263_p2)  ;;  %v490_v24 = vld [vmem:[%s2327_s2 + $0x8] sm:$0xff] (!%p263_p2)  ;;  %v491_v26 = vld [vmem:[%s2327_s2 + $0x10] sm:$0xff] (!%p263_p2) }
   0xa   : > { %v1772_v25 = vpack.c.bf16 (!%p263_p2), %v490_v24, %v489_v23  ;;  %v492_v27 = vld [vmem:[%s2327_s2 + $0x18] sm:$0xff] (!%p263_p2)  ;;  %v493_v29 = vld [vmem:[%s2327_s2 + $0x20] sm:$0xff] (!%p263_p2)  ;;  %v494_v30 = vld [vmem:[%s2327_s2 + $0x28] sm:$0xff] (!%p263_p2) }
   0xb   : > { %v1776_v28 = vpack.c.bf16 (!%p263_p2), %v492_v27, %v491_v26  ;;  %v1780_v31 = vpack.c.bf16 (!%p263_p2), %v494_v30, %v493_v29  ;;  %v495_v32 = vld [vmem:[%s2327_s2 + $0x30] sm:$0xff] (!%p263_p2)  ;;  %v496_v33 = vld [vmem:[%s2327_s2 + $0x38] sm:$0xff] (!%p263_p2)  ;;  %v1375_v35 = vld [vmem:[%s2327_s2 + $0x80] sm:$0xff] (!%p263_p2) }
   0xc   : > { %v1784_v34 = vpack.c.bf16 (!%p263_p2), %v496_v33, %v495_v32  ;;  %v1376_v36 = vld [vmem:[%s2327_s2 + $0x88] sm:$0xff] (!%p263_p2)  ;;  %v1377_v38 = vld [vmem:[%s2327_s2 + $0x90] sm:$0xff] (!%p263_p2)  ;;  %v1378_v39 = vld [vmem:[%s2327_s2 + $0x98] sm:$0xff] (!%p263_p2) }
   0xd   : > { %s2335_s28 = smov (!%p296_p3, %s1350_s28), 1  ;;  %v1788_v37 = vpack.c.bf16 %v1376_v36, %v1375_v35  ;;  %v1792_v42 = vpack.c.bf16 %v1378_v39, %v1377_v38  ;;  %v1379_v43 = vld [vmem:[%s2327_s2 + $0xa0] sm:$0xff]  ;;  %v1380_v44 = vld [vmem:[%s2327_s2 + $0xa8] sm:$0xff]  ;;  %v1381_v48 = vld [vmem:[%s2327_s2 + $0xb0] sm:$0xff] }
   0xe   : > { %s1427_s9 = sshll.u32 %s2335_s28, 4  ;;  %v1796_v46 = vpack.c.bf16 %v1380_v44, %v1379_v43  ;;  %v1382_v49 = vld [vmem:[%s2327_s2 + $0xb8] sm:$0xff]  ;;  %v1390_v51 = vld [vmem:[%s2329_s4 + $0x80] sm:$0xff]  ;;  %v1391_v52 = vld [vmem:[%s2329_s4 + $0x88] sm:$0xff] }
   0xf   : > { %s300_s12 = scalar_lea.vmem %s2325_s0, %s1427_s9  ;;  %v1800_v50 = vpack.c.bf16 %v1382_v49, %v1381_v48  ;;  %v1812_v53 = vpack.c.bf16 %v1391_v52, %v1390_v51  ;;  %v1392_v54 = vld [vmem:[%s2329_s4 + $0x90] sm:$0xff]  ;;  %v1393_v55 = vld [vmem:[%s2329_s4 + $0x98] sm:$0xff]  ;;  %v1394_v57 = vld [vmem:[%s2329_s4 + $0xa0] sm:$0xff]  ;;  %s305_s14 = scalar_lea.vmem %s2333_s8, %s1427_s9 }
  0x10   : > { %v2018_v1 = vld [vmem:[%s300_s12] sm:$0xff]  ;;  %v2020_v2 = vld [vmem:[%s300_s12 + $0x8] sm:$0xff]  ;;  %v1816_v56 = vpack.c.bf16 %v1393_v55, %v1392_v54  ;;  %v1396_v60 = vld [vmem:[%s2329_s4 + $0xb0] sm:$0xff] }
  0x11   : > { %vm320_vm1 = vcmp.ge.f32.partialorder %v2018_v1, 0.0  ;;  %vm321_vm2 = vcmp.ge.f32.partialorder %v2020_v2, 0.0  ;;  %v322_v3 = vmul.f32 0.2, %v2018_v1  ;;  %v323_v4 = vmul.f32 0.2, %v2020_v2 }
  0x12   : > { %v1395_v58 = vld [vmem:[%s2329_s4 + $0xa8] sm:$0xff]  ;;  %v1397_v61 = vld [vmem:[%s2329_s4 + $0xb8] sm:$0xff]  ;;  %v1398_v63 = vld [vmem:[%s2329_s4 + $0xc0] sm:$0xff] }
  0x13   : > { %v324_v5 = vsel %vm320_vm1, %v2018_v1, %v322_v3  ;;  %v325_v6 = vsel %vm321_vm2, %v2020_v2, %v323_v4  ;;  %v1820_v59 = vpack.c.bf16 %v1395_v58, %v1394_v57  ;;  %v1824_v62 = vpack.c.bf16 %v1397_v61, %v1396_v60  ;;  %v1399_v0 = vld [vmem:[%s2329_s4 + $0xc8] sm:$0xff]  ;;  %v1400_v4 = vld [vmem:[%s2329_s4 + $0xd0] sm:$0xff]  ;;  %v1405_v13 = vld [vmem:[%s2329_s4 + $0xf8] sm:$0xff] }
  0x14   : > { %v1748_v7 = vpack.c.bf16 %v325_v6, %v324_v5  ;;  %v1828_v3 = vpack.c.bf16 %v1399_v0, %v1398_v63  ;;  %v1403_v8 = vld [vmem:[%s2329_s4 + $0xe8] sm:$0xff]  ;;  %v926_v26 = vld [vmem:[%s2329_s4] sm:$0xff]  ;;  %v928_v29 = vld [vmem:[%s2329_s4 + $0x10] sm:$0xff] }
  0x15   : > { %v927_v27 = vld [vmem:[%s2329_s4 + $0x8] sm:$0xff]  ;;  %v929_v30 = vld [vmem:[%s2329_s4 + $0x18] sm:$0xff]  ;;  %v930_v32 = vld [vmem:[%s2329_s4 + $0x20] sm:$0xff] }
  0x16   : > { %1749 = vmatprep.subr.bf16.mxu0 %v1748_v7  ;;  %v931_v33 = vld [vmem:[%s2329_s4 + $0x28] sm:$0xff]  ;;  %v934_v36 = vld [vmem:[%s2329_s4 + $0x40] sm:$0xff]  ;;  %v936_v38 = vld [vmem:[%s2329_s4 + $0x50] sm:$0xff] }
  0x17   : > { %1751 = vmatpush3.bf16.msra.mxu0 %v1748_v7  ;;  %v937_v39 = vld [vmem:[%s2329_s4 + $0x58] sm:$0xff]  ;;  %v940_v44 = vld [vmem:[%s2329_s4 + $0x70] sm:$0xff]  ;;  %v1407_v48 = vld [vmem:[%s2329_s4 + $0x108] sm:$0xff] }
  0x18   : > { %1753 = vmatprep.subr.bf16.mxu0 %v1748_v7  ;;  %v1408_v52 = vld [vmem:[%s2329_s4 + $0x110] sm:$0xff]  ;;  %v1410_v57 = vld [vmem:[%s2329_s4 + $0x120] sm:$0xff]  ;;  %v1411_v58 = vld [vmem:[%s2329_s4 + $0x128] sm:$0xff] }
  0x19   : > { %v1884_v60 = vpack.c.bf16 %v1411_v58, %v1410_v57  ;;  %v1413_v63 = vld [vmem:[%s2329_s4 + $0x138] sm:$0xff] }
  0x1a   : > { %1544 = vmatmul.mubr.msk.f32.vlgmr.msra.gmra.mrb[0].mxu0 %vm326_vm0, %v2037_v10 }
  0x1b   : > { %1755 = vmatpush3.bf16.msra.mxu0 %v1748_v7  ;;  %1550 = vmatprep.mubr.msk.f32.mxu0 %vm326_vm0, %v2042_v11  ;;  %v1402_v7 = vld [vmem:[%s2329_s4 + $0xe0] sm:$0xff] }
  0x1c   : > { %1757 = vmatprep.subr.bf16.mxu0 %v1756_v12  ;;  %v1836_v9 = vpack.c.bf16 %v1403_v8, %v1402_v7  ;;  %v1417_v7 = vld [vmem:[%s2329_s4 + $0x158] sm:$0xff] }
  0x1e   : > { %1551 = vmatmul.mubr.msk.f32.vlgmr.msra.gmra.mrb[2].mxu0 %vm326_vm0, %v2057_v15 }
  0x1f   : > { %1759 = vmatpush3.bf16.msra.mxu0 %v1756_v12  ;;  %1569 = vmatprep.mubr.msk.f32.mxu0 %vm506_vm3, %v324_v5  ;;  %v1401_v5 = vld [vmem:[%s2329_s4 + $0xd8] sm:$0xff]  ;;  %v1404_v12 = vld [vmem:[%s2329_s4 + $0xf0] sm:$0xff] }
  0x20   : > { %1761 = vmatprep.subr.bf16.mxu0 %v1760_v16  ;;  %v1840_v14 = vpack.c.bf16 %v1405_v13, %v1404_v12  ;;  %v1419_v12 = vld [vmem:[%s2329_s4 + $0x168] sm:$0xff] }
  0x23   : > { %1763 = vmatpush3.bf16.msra.mxu0 %v1760_v16  ;;  %v1385_v16 = vld [vmem:[%s2328_s3] ss:$0 sm:$0xff] }
  0x24   : > { %1765 = vmatprep.subr.bf16.mxu0 %v1764_v19 }
  0x27   : > { %1767 = vmatpush3.bf16.msra.mxu0 %v1764_v19 }
  0x28   : > { %1769 = vmatprep.subr.bf16.mxu0 %v1768_v22 }
  0x2b   : > { %1771 = vmatpush3.bf16.msra.mxu0 %v1768_v22 }
  0x2c   : > { %1773 = vmatprep.subr.bf16.mxu0 %v1772_v25 }
  0x2e   : > { %1570 = vmatmul.mubr.msk.f32.vlgmr.msra.gmra.mrb[4].mxu0 %vm506_vm3, %v325_v6  ;;  %v1832_v6 = vpack.c.bf16 %v1401_v5, %v1400_v4  ;;  %v1415_v4 = vld [vmem:[%s2329_s4 + $0x148] sm:$0xff] }
  0x2f   : > { %1775 = vmatpush3.bf16.msra.mxu0 %v1772_v25 }
  0x30   : > { %1777 = vmatprep.subr.bf16.mxu0 %v1776_v28 }
  0x33   : > { %1779 = vmatpush3.bf16.msra.mxu0 %v1776_v28  ;;  %v1844_v28 = vpack.c.bf16 %v927_v27, %v926_v26  ;;  %v318_v27 = vld [vmem:[%s2326_s1 + $0x30] sm:$0xff] }
  0x34   : > { %1781 = vmatprep.subr.bf16.mxu0 %v1780_v31 }
  0x37   : > { %1783 = vmatpush3.bf16.msra.mxu0 %v1780_v31  ;;  %v1848_v31 = vpack.c.bf16 %v929_v30, %v928_v29 }
  0x38   : > { %1785 = vmatprep.subr.bf16.mxu0 %v1784_v34 }
  0x3b   : > { %1787 = vmatpush3.bf16.msra.mxu0 %v1784_v34  ;;  %v933_v34 = vld [vmem:[%s2329_s4 + $0x38] sm:$0xff] }
  0x3c   : > { %1789 = vmatprep.subr.bf16.mxu0 %v1788_v37 }
  0xed   : > { %v1545_v40 = vpop.f32.mrb[0].mxu0 }
  0xee   : > { %v399_v41 = vpop.f32.mrb[1].mxu0 }
  0xef   : > { %1588 = vmatprep.mubr.msk.f32.mxu0 %vm506_vm3, %v399_v41  ;;  %v938_v41 = vld [vmem:[%s2329_s4 + $0x60] sm:$0xff] }
  0xf0   : > { %1589 = vmatmul.mubr.msk.f32.vlgmr.msra.gmra.mrb[4].mxu0 %vm506_vm3, %v1545_v40  ;;  %v1864_v40 = vpack.c.bf16 %v937_v39, %v936_v38 }
  0xf1   : > { %1791 = vmatpush3.bf16.msra.mxu0 %v1788_v37  ;;  %v1552_v45 = vpop.f32.mrb[2].mxu0 }
  0xf2   : > { %1793 = vmatprep.subr.bf16.mxu0 %v1792_v42  ;;  %v480_v47 = vpop.f32.mrb[3].mxu0 }
  0xf3   : > { %1607 = vmatprep.mubr.msk.f32.mxu0 %vm506_vm3, %v480_v47  ;;  %v1406_v47 = vld [vmem:[%s2329_s4 + $0x100] sm:$0xff] }
  0xf4   : > { %v1876_v49 = vpack.c.bf16 %v1407_v48, %v1406_v47 }
  0xf5   : > { %1795 = vmatpush3.bf16.msra.mxu0 %v1792_v42  ;;  %v939_v42 = vld [vmem:[%s2329_s4 + $0x68] sm:$0xff] }
  0xf6   : > { %1797 = vmatprep.subr.bf16.mxu0 %v1796_v46  ;;  %v1868_v43 = vpack.c.bf16 %v939_v42, %v938_v41 }
  0xf9   : > { %1799 = vmatpush3.bf16.msra.mxu0 %v1796_v46 }
  0xfa   : > { %1801 = vmatprep.subr.bf16.mxu0 %v1800_v50 }
  0xfd   : > { %1803 = vmatpush3.bf16.msra.mxu0 %v1800_v50 }
  0xfe   : > { %1813 = vmatprep.subr.bf16.mxu0 %v1812_v53 }
 0x100   : > { %1608 = vmatmul.mubr.msk.f32.vlgmr.msra.gmra.mrb[4].mxu0 %vm506_vm3, %v1552_v45  ;;  %v941_v45 = vld [vmem:[%s2329_s4 + $0x78] sm:$0xff] }
 0x101   : > { %1815 = vmatpush3.bf16.msra.mxu0 %v1812_v53  ;;  %v1872_v46 = vpack.c.bf16 %v941_v45, %v940_v44  ;;  %v1409_v53 = vld [vmem:[%s2329_s4 + $0x118] sm:$0xff] }
 0x102   : > { %1817 = vmatprep.subr.bf16.mxu0 %v1816_v56 }
 0x105   : > { %1819 = vmatpush3.bf16.msra.mxu0 %v1816_v56  ;;  %v1880_v56 = vpack.c.bf16 %v1409_v53, %v1408_v52 }
 0x106   : > { %1821 = vmatprep.subr.bf16.mxu0 %v1820_v59 }
 0x109   : > { %1823 = vmatpush3.bf16.msra.mxu0 %v1820_v59 }
 0x10a   : > { %1825 = vmatprep.subr.bf16.mxu0 %v1824_v62 }
 0x10d   : > { %1827 = vmatpush3.bf16.msra.mxu0 %v1824_v62  ;;  %v1412_v62 = vld [vmem:[%s2329_s4 + $0x130] sm:$0xff] }
 0x10e   : > { %1829 = vmatprep.subr.bf16.mxu0 %v1828_v3  ;;  %v1888_v0 = vpack.c.bf16 %v1413_v63, %v1412_v62 }
 0x111   : > { %1831 = vmatpush3.bf16.msra.mxu0 %v1828_v3  ;;  %v1414_v3 = vld [vmem:[%s2329_s4 + $0x140] sm:$0xff] }
 0x112   : > { %1833 = vmatprep.subr.bf16.mxu0 %v1832_v6  ;;  %v1892_v5 = vpack.c.bf16 %v1415_v4, %v1414_v3 }
 0x115   : > { %1835 = vmatpush3.bf16.msra.mxu0 %v1832_v6  ;;  %v1416_v6 = vld [vmem:[%s2329_s4 + $0x150] sm:$0xff] }
 0x116   : > { %1837 = vmatprep.subr.bf16.mxu0 %v1836_v9  ;;  %v1896_v8 = vpack.c.bf16 %v1417_v7, %v1416_v6 }
 0x119   : > { %1839 = vmatpush3.bf16.msra.mxu0 %v1836_v9  ;;  %v1418_v9 = vld [vmem:[%s2329_s4 + $0x160] sm:$0xff] }
 0x11a   : > { %1841 = vmatprep.subr.bf16.mxu0 %v1840_v14  ;;  %v1900_v13 = vpack.c.bf16 %v1419_v12, %v1418_v9 }
 0x11d   : > { %1843 = vmatpush3.bf16.msra.mxu0 %v1840_v14  ;;  %v1420_v14 = vld [vmem:[%s2329_s4 + $0x170] sm:$0xff] }
 0x1d3   : > { %v1609_v17 = vpop.f32.mrb[4].mxu0 }
 0x1d4   : > { %v769_v18 = vadd.f32 %v1609_v17, %v1385_v16  ;;  %v750_v19 = vpop.f32.mrb[5].mxu0 }
 0x1d5   : > { %v768_v20 = vadd.f32 %v1385_v16, %v750_v19  ;;  %v1421_v16 = vld [vmem:[%s2329_s4 + $0x178] sm:$0xff]  ;;  %v313_v19 = vld [vmem:[%s2326_s1 + $0x8] sm:$0xff] }
 0x1d6   : > { %vm771_vm4 = vcmp.ge.f32.partialorder %v769_v18, 0.0  ;;  %v773_v21 = vmul.f32 0.2, %v769_v18  ;;  %v1904_v17 = vpack.c.bf16 %v1421_v16, %v1420_v14 }
 0x1d7   : > { %v772_v22 = vmul.f32 0.2, %v768_v20  ;;  %vm770_vm5 = vcmp.ge.f32.partialorder %v768_v20, 0.0 }
 0x1d8   : > { %v775_v23 = vsel %vm771_vm4, %v769_v18, %v773_v21  ;;  %v312_v18 = vld [vmem:[%s2326_s1] sm:$0xff]  ;;  %v314_v21 = vld [vmem:[%s2326_s1 + $0x10] sm:$0xff] }
 0x1d9   : > { %v774_v24 = vsel %vm770_vm5, %v768_v20, %v772_v22  ;;  %v1908_v20 = vpack.c.bf16 %v313_v19, %v312_v18  ;;  %v315_v22 = vld [vmem:[%s2326_s1 + $0x18] sm:$0xff] }
 0x1da   : > { %v1804_v25 = vpack.c.bf16 %v775_v23, %v774_v24  ;;  %1656 = vmatprep.mubr.f32.mxu0 %v774_v24  ;;  %v316_v24 = vld [vmem:[%s2326_s1 + $0x20] sm:$0xff] }
 0x1db   : > { %1657 = vmatmul.mubr.f32.vlgmr.msra.gmra.mrb[6].mxu0 %v775_v23  ;;  %v1912_v23 = vpack.c.bf16 %v315_v22, %v314_v21 }
 0x1dc   : > { %1805 = vmatprep.subr.bf16.mxu1 %v1804_v25 }
 0x1dd   : > { %1807 = vmatpush3.bf16.msra.mxu1 %v1804_v25 }
 0x1de   : > { %1809 = vmatprep.subr.bf16.mxu1 %v1804_v25 }
 0x1e0   : > { %1615 = vmatmul.mubr.msk.f32.vlgmr.msra.gmra.mrb[0].mxu1 %vm326_vm0, %v2037_v10  ;;  %v1852_v10 = vpack.c.bf16 %v931_v33, %v930_v32 }
 0x1e1   : > { %1811 = vmatpush3.bf16.msra.mxu1 %v1804_v25  ;;  %1621 = vmatprep.mubr.msk.f32.mxu1 %vm326_vm0, %v2042_v11  ;;  %v932_v11 = vld [vmem:[%s2329_s4 + $0x30] sm:$0xff]  ;;  %v317_v25 = vld [vmem:[%s2326_s1 + $0x28] sm:$0xff] }
 0x1e2   : > { %1845 = vmatprep.subr.bf16.mxu1 %v1844_v28  ;;  %v1856_v35 = vpack.c.bf16 %v933_v34, %v932_v11  ;;  %v1916_v26 = vpack.c.bf16 %v317_v25, %v316_v24 }
 0x1e4   : > { %1622 = vmatmul.mubr.msk.f32.vlgmr.msra.gmra.mrb[2].mxu1 %vm326_vm0, %v2057_v15  ;;  %v935_v15 = vld [vmem:[%s2329_s4 + $0x48] sm:$0xff] }
 0x1e5   : > { %1847 = vmatpush3.bf16.msra.mxu1 %v1844_v28  ;;  %v1860_v37 = vpack.c.bf16 %v935_v15, %v934_v36  ;;  %v319_v28 = vld [vmem:[%s2326_s1 + $0x38] sm:$0xff] }
 0x1e6   : > { %1849 = vmatprep.subr.bf16.mxu1 %v1848_v31  ;;  %v1920_v29 = vpack.c.bf16 %v319_v28, %v318_v27 }
 0x1e9   : > { %1851 = vmatpush3.bf16.msra.mxu1 %v1848_v31 }
 0x1ea   : > { %1853 = vmatprep.subr.bf16.mxu1 %v1852_v10 }
 0x1ed   : > { %1855 = vmatpush3.bf16.msra.mxu1 %v1852_v10 }
 0x1ee   : > { %1857 = vmatprep.subr.bf16.mxu1 %v1856_v35 }
 0x1f1   : > { %1859 = vmatpush3.bf16.msra.mxu1 %v1856_v35 }
 0x1f2   : > { %1861 = vmatprep.subr.bf16.mxu1 %v1860_v37 }
 0x1f5   : > { %1863 = vmatpush3.bf16.msra.mxu1 %v1860_v37 }
 0x1f6   : > { %1865 = vmatprep.subr.bf16.mxu1 %v1864_v40 }
 0x1f9   : > { %1867 = vmatpush3.bf16.msra.mxu1 %v1864_v40 }
 0x1fa   : > { %1869 = vmatprep.subr.bf16.mxu1 %v1868_v43 }
 0x1fd   : > { %1871 = vmatpush3.bf16.msra.mxu1 %v1868_v43 }
 0x1fe   : > { %1873 = vmatprep.subr.bf16.mxu1 %v1872_v46 }
 0x201   : > { %1875 = vmatpush3.bf16.msra.mxu1 %v1872_v46 }
 0x202   : > { %1877 = vmatprep.subr.bf16.mxu1 %v1876_v49 }
 0x2ae   : > { %v2238_v50 = vpop.f32.mrb[6].mxu0 }
 0x2af   : > { %v2240_v51 = vpop.f32.mrb[7].mxu0 }
 0x2b3   : > { %v1616_v54 = vpop.f32.mrb[0].mxu1 }
 0x2b4   : > { %v842_v55 = vpop.f32.mrb[1].mxu1 }
 0x2b5   : > { %1691 = vmatprep.mubr.f32.mxu1 %v842_v55 }
 0x2b6   : > { %1692 = vmatmul.mubr.f32.vlgmr.msra.gmra.mrb[4].mxu1 %v1616_v54 }
 0x2b7   : > { %1879 = vmatpush3.bf16.msra.mxu1 %v1876_v49  ;;  %v1623_v59 = vpop.f32.mrb[2].mxu1 }
 0x2b8   : > { %1881 = vmatprep.subr.bf16.mxu1 %v1880_v56  ;;  %v917_v61 = vpop.f32.mrb[3].mxu1 }
 0x2b9   : > { %1726 = vmatprep.mubr.f32.mxu1 %v917_v61 }
 0x2bb   : > { %1883 = vmatpush3.bf16.msra.mxu1 %v1880_v56 }
 0x2bc   : > { %1885 = vmatprep.subr.bf16.mxu1 %v1884_v60 }
 0x2bf   : > { %1887 = vmatpush3.bf16.msra.mxu1 %v1884_v60 }
 0x2c0   : > { %1889 = vmatprep.subr.bf16.mxu1 %v1888_v0 }
 0x2c3   : > { %1891 = vmatpush3.bf16.msra.mxu1 %v1888_v0 }
 0x2c4   : > { %1893 = vmatprep.subr.bf16.mxu1 %v1892_v5 }
 0x2c7   : > { %1895 = vmatpush3.bf16.msra.mxu1 %v1892_v5 }
 0x2c8   : > { %1897 = vmatprep.subr.bf16.mxu1 %v1896_v8 }
 0x2cb   : > { %1899 = vmatpush3.bf16.msra.mxu1 %v1896_v8 }
 0x2cc   : > { %1901 = vmatprep.subr.bf16.mxu1 %v1900_v13 }
 0x2cf   : > { %1903 = vmatpush3.bf16.msra.mxu1 %v1900_v13 }
 0x2d0   : > { %1905 = vmatprep.subr.bf16.mxu1 %v1904_v17 }
 0x2d3   : > { %1907 = vmatpush3.bf16.msra.mxu1 %v1904_v17 }
 0x2d4   : > { %1909 = vmatprep.subr.bf16.mxu1 %v1908_v20 }
 0x2d6   : > { %1727 = vmatmul.mubr.f32.vlgmr.msra.gmra.mrb[4].mxu1 %v1623_v59 }
 0x2d7   : > { %1911 = vmatpush3.bf16.msra.mxu1 %v1908_v20  ;;  %1745 = vmatprep.mubr.msk.f32.mxu1 %vm506_vm3, %v2018_v1  ;;  %v1422_v1 = vld [vmem:[%s2330_s5] ss:$0 sm:$0xff] }
 0x2d8   : > { %1913 = vmatprep.subr.bf16.mxu1 %v1912_v23  ;;  %v1924_v30 = vadd.f32 %v2238_v50, %v1422_v1  ;;  %v1926_v31 = vadd.f32 %v1422_v1, %v2240_v51 }
 0x2db   : > { %1915 = vmatpush3.bf16.msra.mxu1 %v1912_v23 }
 0x2dc   : > { %1917 = vmatprep.subr.bf16.mxu1 %v1916_v26 }
 0x2df   : > { %1919 = vmatpush3.bf16.msra.mxu1 %v1916_v26 }
 0x2e0   : > { %1921 = vmatprep.subr.bf16.mxu1 %v1920_v29 }
 0x2e3   : > { %1923 = vmatpush3.bf16.msra.mxu1 %v1920_v29 }
 0x2e6   : > { %1746 = vmatmul.mubr.msk.f32.vlgmr.msra.gmra.mrb[4].mxu1 %vm506_vm3, %v2020_v2 }
 0x3b9   : > { %v1747_v32 = vpop.f32.mrb[4].mxu1 }
 0x3ba   : > { %v1925_v33 = vadd.f32 %v1924_v30, %v1747_v32  ;;  %v1284_v10 = vpop.f32.mrb[5].mxu1 }
 0x3bb   : > { %v1927_v11 = vadd.f32 %v1926_v31, %v1284_v10 }
 0x3bc   : > { %1294 = vst [vmem:[%s305_s14 + $0x8] sm:$0xff] %v1925_v33 }
 0x3bd   : > { %1293 = vst [vmem:[%s305_s14] sm:$0xff] %v1927_v11 }
 0x3be PF: > { %s18_s27 = sadd.s32 1, %s1950_s27  }
 0x3bf   : > { %p15_p4 = scmp.ge.s32.totalorder %s18_s27, 4  }
 0x3c1   :  { %17 = sbr.rel (!%p15_p4) target bundleno = 1 (0x1), region = 86 }

</bundles_post_ra>
